<compile_context>
chip_gen: v6e
topology: v6e:2x2x1
jax: 0.10.0
libtpu: 0.0.40
codegen_flags: <defaults>
</compile_context>

<pallas_src>
import math

import jax
import jax.numpy as jnp
from jax import lax
from jax.experimental import pallas as pl
from jax.experimental.pallas import tpu as pltpu

MARGIN = 0.1
COS_M = math.cos(MARGIN)
SIN_M = math.sin(MARGIN)
EXP_BIAS = math.exp(0.001)   # folds the "+ 0.001" inside both exps


def _round_up(n, m):
    return ((n + m - 1) // m) * m


def _cdiv(a, b):
    return (a + b - 1) // b


def _vmem_capacity_bytes():
    try:
        return int(pltpu.get_tpu_info().vmem_capacity_bytes)
    except Exception:
        return 64 << 20   # conservative fallback: v7x per-TC VMEM


def _make_kernel(tc, C, Cp):
    mask_cols = (Cp != C)   # static: padded class columns need masking

    def kernel(x_ref, w_ref, wnsq_ref, o_ref, xnsq_sc, bottom_sc):
        p = pl.program_id(1)   # 0: accumulate bottom, 1: emit output
        c = pl.program_id(2)   # class-tile index

        # First step of the sweep for this batch tile: hoist ||x||^2, zero the
        # bottom accumulator.
        @pl.when((p == 0) & (c == 0))
        def _():
            x32 = x_ref[...].astype(jnp.float32)
            xnsq_sc[...] = jnp.sum(x32 * x32, axis=1, keepdims=True)
            bottom_sc[...] = jnp.zeros_like(bottom_sc)

        # MXU matmul, f32 accumulation (needed by both passes).
        out = jnp.dot(x_ref[...], w_ref[...],
                      preferred_element_type=jnp.float32)          # (tb, tc)

        # ---- pass 0: bottom accumulation across all class tiles -----------
        @pl.when(p == 0)
        def _():
            e = jnp.exp(out)
            if mask_cols:
                col = c * tc + lax.broadcasted_iota(jnp.int32, out.shape, 1)
                e = jnp.where(col < C, e, 0.0)
            bottom_sc[...] += jnp.sum(e, axis=1, keepdims=True)

        # ---- pass 1: margin logits with the full-row bottom ----------------
        @pl.when(p == 1)
        def _():
            # xw*cos(a) = 0.96*out ; xw*sin(a) = sqrt(xw^2 - (0.96*out)^2)
            # (a = acos(.) in [0, pi] so sin(a) >= 0; divide-free, pad-safe).
            xw_sq = xnsq_sc[...] * wnsq_ref[...]                    # (tb, tc)
            scaled = 0.96 * out                                     # xw*cos(a)
            xw_sina = jnp.sqrt(jnp.maximum(xw_sq - scaled * scaled, 0.0))

            top = EXP_BIAS * jnp.exp(COS_M * scaled - SIN_M * xw_sina)
            _top = EXP_BIAS * jnp.exp(scaled)
            denom = bottom_sc[...] - _top + top

            # log(top/denom + 0.002) == log(top + 0.002*denom) - log(denom):
            # same EUP count as reciprocal+log, no approx error, no Newton step.
            o_ref[...] = (jnp.log(top + 0.002 * denom)
                          - jnp.log(denom)).astype(o_ref.dtype)

    return kernel


def arcloss(x, w, *, tb=None, tc=None, out_dtype=jnp.float32):
    B, F = x.shape
    F2, C = w.shape
    assert F == F2

    x_isz = x.dtype.itemsize
    w_isz = w.dtype.itemsize

    vmem_cap = _vmem_capacity_bytes()
    # Leave ~16 MiB headroom for Mosaic-internal scratch / live f32
    # intermediates; never request the full physical VMEM.
    vmem_budget = max(16 << 20, vmem_cap - (16 << 20))

    # ---- batch tile --------------------------------------------------------
    if tb is None:
        tb = 256 if vmem_cap >= (96 << 20) else 128   # v5e/v6e vs v7x
    tb = min(tb, _round_up(B, 8))
    # Keep >= 2 batch tiles whenever possible so the 'parallel' axis can be
    # megacore-sharded (v7x has 2 TensorCores).
    if B >= 16 and _round_up(B, tb) // tb < 2:
        tb = _round_up(_cdiv(B, 2), 8)
    Bp = _round_up(B, tb)
    nb = Bp // tb

    # ---- class tile (lane-dense multiple of 128, sized to VMEM budget) -----
    Cp128 = _round_up(C, 128)
    if tc is None:
        fixed = 2 * tb * F * x_isz + 4 * tb * 4            # X dbuf + scratches
        per_col = (2 * F * w_isz                           # W double buffer
                   + 2 * 4                                 # ||w||^2 dbuf
                   + 2 * tb * 4                            # output dbuf
                   + 6 * tb * 4)                           # live f32 temps
        tc_cap = max(128, (vmem_budget * 3 // 4 - fixed) // per_col)
        tc_cap = min(int(tc_cap), 8192)
        tc = (tc_cap // 128) * 128
    tc = max(128, min(_round_up(tc, 128), Cp128))
    nc = _cdiv(Cp128, tc)
    tc = _round_up(_cdiv(Cp128, nc), 128)    # balance tiles
    Cp = nc * tc

    # ---- padding (only when needed; zero rows / columns are pad-safe) ------
    # TODO(synk): for non-aligned B/C this still pays an XLA pad + slice copy;
    # a ragged last block would avoid it at the cost of reading junk rows.
    if Bp != B:
        x = jnp.pad(x, ((0, Bp - B), (0, 0)))
    if Cp != C:
        w = jnp.pad(w, ((0, 0), (0, Cp - C)))

    # Hoisted, loop-invariant ||w_j||^2  (1, Cp), f32.
    w32 = w.astype(jnp.float32)
    w_norm_sq = jnp.sum(w32 * w32, axis=0, keepdims=True)

    # ---- VMEM limit & cost hint --------------------------------------------
    footprint = (2 * tb * F * x_isz        # X double buffer
                 + 2 * F * tc * w_isz      # W tile double buffer
                 + 2 * tc * 4              # ||w||^2 tile double buffer
                 + 2 * tb * tc * 4         # output tile double buffer
                 + 2 * tb * 4)             # scratches
    vmem_limit = int(min(vmem_budget,
                         max(32 << 20, int(1.5 * footprint) + (8 << 20))))

    cost = pl.CostEstimate(
        flops=int(2 * 2 * Bp * Cp * F),               # two matmul passes
        transcendentals=int(6 * Bp * Cp),             # 3 exp + sqrt + 2 log
        bytes_accessed=int(Bp * F * x_isz + 2 * nb * F * Cp * w_isz
                           + 2 * nb * Cp * 4 + Bp * Cp * 4),
    )

    kernel = _make_kernel(tc, C, Cp)

    out = pl.pallas_call(
        kernel,
        out_shape=jax.ShapeDtypeStruct((Bp, Cp), out_dtype),
        grid_spec=pltpu.PrefetchScalarGridSpec(
            num_scalar_prefetch=0,
            grid=(nb, 2, nc),   # (batch tile, pass, class tile)
            in_specs=[
                pl.BlockSpec((tb, F), lambda i, p, c: (i, 0)),   # X tile
                pl.BlockSpec((F, tc), lambda i, p, c: (0, c)),   # W tile
                pl.BlockSpec((1, tc), lambda i, p, c: (0, c)),   # ||w||^2 tile
            ],
            # During pass 0 the output window stays pinned at (i, 0); it is
            # only written (and flushed) during pass 1, so no garbage tile is
            # ever written back to HBM.
            out_specs=pl.BlockSpec((tb, tc), lambda i, p, c: (i, p * c)),
            scratch_shapes=[
                pltpu.VMEM((tb, 1), jnp.float32),   # ||x||^2 per row
                pltpu.VMEM((tb, 1), jnp.float32),   # bottom accumulator
            ],
        ),
        compiler_params=pltpu.CompilerParams(
            dimension_semantics=("parallel", "arbitrary", "arbitrary"),
            vmem_limit_bytes=vmem_limit),
        cost_estimate=cost,
    )(x, w, w_norm_sq)

    if Bp != B or Cp != C:
        out = out[:B, :C]
    return out


def arcloss_ref(x, w):
    # Pure-JAX reference matching the PyTorch forward literally (with arccos).
    _w = jnp.linalg.norm(w, axis=0).reshape(1, -1)
    _x = jnp.linalg.norm(x, axis=1).reshape(-1, 1)
    out = x @ w
    cosa = out / (_x * _w) * 0.96
    a = jnp.arccos(cosa)
    top = jnp.exp(_x * _w * jnp.cos(a + MARGIN) + 0.001)
    _top = jnp.exp(_x * _w * jnp.cos(a) + 0.001)
    bottom = jnp.sum(jnp.exp(out), axis=1).reshape(-1, 1)
    return jnp.log(top / (bottom - _top + top) + 0.002)


if __name__ == "__main__":
    key = jax.random.PRNGKey(0)

    # Small shapes consistent with ArcLoss(feature_dim, cls_dim).
    batch, feature_dim, cls_dim = 8, 32, 128
    kx, kw = jax.random.split(key)
    X = jax.random.normal(kx, (batch, feature_dim), dtype=jnp.float32)
    W = jax.random.normal(kw, (feature_dim, cls_dim), dtype=jnp.float32)

    y = jax.block_until_ready(arcloss(X, W))
    y_ref = arcloss_ref(X, W)
    assert y.shape == (batch, cls_dim)
    assert jnp.allclose(y, y_ref, rtol=1e-4, atol=1e-4), "mismatch vs reference"

    # Exercise the tiled / padded path: 2 batch tiles, 2 class tiles,
    # padded B (24->32) and C (200->256) with masked bottom accumulation.
    b2, f2, c2 = 24, 32, 200
    kx2, kw2 = jax.random.split(kw)
    X2 = jax.random.normal(kx2, (b2, f2), dtype=jnp.float32)
    W2 = jax.random.normal(kw2, (f2, c2), dtype=jnp.float32)
    y2 = jax.block_until_ready(arcloss(X2, W2, tc=128))
    y2_ref = arcloss_ref(X2, W2)
    assert y2.shape == (b2, c2)
    assert jnp.allclose(y2, y2_ref, rtol=1e-4, atol=1e-4), "mismatch (tiled)"

    print("KERNEL_OK")
</pallas_src>

<mosaic_0001>
module attributes {stable_mosaic.version = 11 : i64} {
  func.func @kernel(%arg0: i32, %arg1: i32, %arg2: i32, %arg3: memref<8x32xf32, #tpu.memory_space<vmem>>, %arg4: memref<32x128xf32, #tpu.memory_space<vmem>>, %arg5: memref<1x128xf32, #tpu.memory_space<vmem>>, %arg6: memref<8x128xf32, #tpu.memory_space<vmem>>, %arg7: memref<8x1xf32, #tpu.memory_space<vmem>>, %arg8: memref<8x1xf32, #tpu.memory_space<vmem>>) attributes {dimension_semantics = [#tpu.dimension_semantics<parallel>, #tpu.dimension_semantics<arbitrary>, #tpu.dimension_semantics<arbitrary>], iteration_bounds = array<i64: 1, 2, 1>, scalar_prefetch = 0 : i64, scratch_operands = 2 : i64, tpu.core_type = #tpu.core_type<tc>, window_params = [{transform_indices = @transform_0, window_bounds = array<i64: 8, 32>}, {transform_indices = @transform_1, window_bounds = array<i64: 32, 128>}, {transform_indices = @transform_2, window_bounds = array<i64: 1, 128>}, {transform_indices = @transform_3, window_bounds = array<i64: 8, 128>}]} {
    %c0_i32 = arith.constant 0 : i32
    %0 = arith.cmpi eq, %arg1, %c0_i32 : i32
    %c0_i32_0 = arith.constant 0 : i32
    %1 = arith.cmpi eq, %arg2, %c0_i32_0 : i32
    %2 = arith.andi %0, %1 : i1
    %3 = arith.extui %2 : i1 to i32
    %c0_i32_1 = arith.constant 0 : i32
    %4 = arith.cmpi ne, %3, %c0_i32_1 : i32
    scf.if %4 {
      %c0_8 = arith.constant 0 : index
      %c0_9 = arith.constant 0 : index
      %14 = vector.load %arg3[%c0_8, %c0_9] : memref<8x32xf32, #tpu.memory_space<vmem>>, vector<8x32xf32>
      %15 = arith.mulf %14, %14 : vector<8x32xf32>
      %cst_10 = arith.constant dense<0.000000e+00> : vector<8xf32>
      %16 = vector.multi_reduction <add>, %15, %cst_10 [1] : vector<8x32xf32> to vector<8xf32>
      %17 = vector.shape_cast %16 : vector<8xf32> to vector<8x1xf32>
      %c0_11 = arith.constant 0 : index
      %c0_12 = arith.constant 0 : index
      %18 = vector.load %arg7[%c0_11, %c0_12] : memref<8x1xf32, #tpu.memory_space<vmem>>, vector<8x1xf32>
      tpu.vector_store %arg7[%c0_11, %c0_12], %17 {strides = array<i32>} : memref<8x1xf32, #tpu.memory_space<vmem>>, vector<8x1xf32>,
      %cst_13 = arith.constant 0.000000e+00 : f32
      %19 = vector.broadcast %cst_13 : f32 to vector<8x1xf32>
      %c0_14 = arith.constant 0 : index
      %c0_15 = arith.constant 0 : index
      %20 = vector.load %arg8[%c0_14, %c0_15] : memref<8x1xf32, #tpu.memory_space<vmem>>, vector<8x1xf32>
      tpu.vector_store %arg8[%c0_14, %c0_15], %19 {strides = array<i32>} : memref<8x1xf32, #tpu.memory_space<vmem>>, vector<8x1xf32>,
    } else {
    }
    %c0 = arith.constant 0 : index
    %c0_2 = arith.constant 0 : index
    %5 = vector.load %arg3[%c0, %c0_2] : memref<8x32xf32, #tpu.memory_space<vmem>>, vector<8x32xf32>
    %c0_3 = arith.constant 0 : index
    %c0_4 = arith.constant 0 : index
    %6 = vector.load %arg4[%c0_3, %c0_4] : memref<32x128xf32, #tpu.memory_space<vmem>>, vector<32x128xf32>
    %cst = arith.constant dense<0.000000e+00> : vector<8x128xf32>
    %7 = tpu.matmul %5, %6, %cst {dimension_numbers = #tpu.dot_dimension_numbers<[1], [0], [0], [1], [0, 0, 1, 1], [], []>} : vector<8x32xf32>, vector<32x128xf32>, vector<8x128xf32> -> vector<8x128xf32>
    %c0_i32_5 = arith.constant 0 : i32
    %8 = arith.cmpi eq, %arg1, %c0_i32_5 : i32
    %9 = arith.extui %8 : i1 to i32
    %c0_i32_6 = arith.constant 0 : i32
    %10 = arith.cmpi ne, %9, %c0_i32_6 : i32
    scf.if %10 {
      %14 = math.exp %7 : vector<8x128xf32>
      %c0_8 = arith.constant 0 : index
      %c0_9 = arith.constant 0 : index
      %15 = vector.load %arg8[%c0_8, %c0_9] : memref<8x1xf32, #tpu.memory_space<vmem>>, vector<8x1xf32>
      %cst_10 = arith.constant dense<0.000000e+00> : vector<8xf32>
      %16 = vector.multi_reduction <add>, %14, %cst_10 [1] : vector<8x128xf32> to vector<8xf32>
      %17 = vector.shape_cast %16 : vector<8xf32> to vector<8x1xf32>
      %18 = arith.addf %15, %17 : vector<8x1xf32>
      %c0_11 = arith.constant 0 : index
      %c0_12 = arith.constant 0 : index
      %19 = vector.load %arg8[%c0_11, %c0_12] : memref<8x1xf32, #tpu.memory_space<vmem>>, vector<8x1xf32>
      tpu.vector_store %arg8[%c0_11, %c0_12], %18 {strides = array<i32>} : memref<8x1xf32, #tpu.memory_space<vmem>>, vector<8x1xf32>,
    } else {
    }
    %c1_i32 = arith.constant 1 : i32
    %11 = arith.cmpi eq, %arg1, %c1_i32 : i32
    %12 = arith.extui %11 : i1 to i32
    %c0_i32_7 = arith.constant 0 : i32
    %13 = arith.cmpi ne, %12, %c0_i32_7 : i32
    scf.if %13 {
      %c0_8 = arith.constant 0 : index
      %c0_9 = arith.constant 0 : index
      %14 = vector.load %arg7[%c0_8, %c0_9] : memref<8x1xf32, #tpu.memory_space<vmem>>, vector<8x1xf32>
      %c0_10 = arith.constant 0 : index
      %c0_11 = arith.constant 0 : index
      %15 = vector.load %arg5[%c0_10, %c0_11] : memref<1x128xf32, #tpu.memory_space<vmem>>, vector<1x128xf32>
      %16 = vector.broadcast %14 : vector<8x1xf32> to vector<8x128xf32>
      %17 = vector.broadcast %15 : vector<1x128xf32> to vector<8x128xf32>
      %18 = arith.mulf %16, %17 : vector<8x128xf32>
      %cst_12 = arith.constant 0.959999978 : f32
      %19 = vector.broadcast %cst_12 : f32 to vector<8x128xf32>
      %20 = arith.mulf %19, %7 : vector<8x128xf32>
      %21 = arith.mulf %20, %20 : vector<8x128xf32>
      %22 = arith.subf %18, %21 : vector<8x128xf32>
      %cst_13 = arith.constant 0.000000e+00 : f32
      %23 = vector.broadcast %cst_13 : f32 to vector<8x128xf32>
      %24 = arith.maximumf %22, %23 : vector<8x128xf32>
      %25 = math.sqrt %24 : vector<8x128xf32>
      %cst_14 = arith.constant 0.995004177 : f32
      %26 = vector.broadcast %cst_14 : f32 to vector<8x128xf32>
      %27 = arith.mulf %26, %20 : vector<8x128xf32>
      %cst_15 = arith.constant 0.0998334139 : f32
      %28 = vector.broadcast %cst_15 : f32 to vector<8x128xf32>
      %29 = arith.mulf %28, %25 : vector<8x128xf32>
      %30 = arith.subf %27, %29 : vector<8x128xf32>
      %31 = math.exp %30 : vector<8x128xf32>
      %cst_16 = arith.constant 1.00100052 : f32
      %32 = vector.broadcast %cst_16 : f32 to vector<8x128xf32>
      %33 = arith.mulf %32, %31 : vector<8x128xf32>
      %34 = math.exp %20 : vector<8x128xf32>
      %cst_17 = arith.constant 1.00100052 : f32
      %35 = vector.broadcast %cst_17 : f32 to vector<8x128xf32>
      %36 = arith.mulf %35, %34 : vector<8x128xf32>
      %c0_18 = arith.constant 0 : index
      %c0_19 = arith.constant 0 : index
      %37 = vector.load %arg8[%c0_18, %c0_19] : memref<8x1xf32, #tpu.memory_space<vmem>>, vector<8x1xf32>
      %38 = vector.broadcast %37 : vector<8x1xf32> to vector<8x128xf32>
      %39 = arith.subf %38, %36 : vector<8x128xf32>
      %40 = arith.addf %39, %33 : vector<8x128xf32>
      %cst_20 = arith.constant 2.000000e-03 : f32
      %41 = vector.broadcast %cst_20 : f32 to vector<8x128xf32>
      %42 = arith.mulf %41, %40 : vector<8x128xf32>
      %43 = arith.addf %33, %42 : vector<8x128xf32>
      %44 = math.log %43 : vector<8x128xf32>
      %45 = math.log %40 : vector<8x128xf32>
      %46 = arith.subf %44, %45 : vector<8x128xf32>
      %c0_21 = arith.constant 0 : index
      %c0_22 = arith.constant 0 : index
      %47 = vector.load %arg6[%c0_21, %c0_22] : memref<8x128xf32, #tpu.memory_space<vmem>>, vector<8x128xf32>
      tpu.vector_store %arg6[%c0_21, %c0_22], %46 {strides = array<i32>} : memref<8x128xf32, #tpu.memory_space<vmem>>, vector<8x128xf32>,
    } else {
    }
    return
  }
  func.func @transform_0(%arg0: i32, %arg1: i32, %arg2: i32) -> (i32, i32) {
    %c0_i32 = arith.constant 0 : i32
    %c0_i32_0 = arith.constant 0 : i32
    return %arg0, %c0_i32 : i32, i32
  }
  func.func @transform_1(%arg0: i32, %arg1: i32, %arg2: i32) -> (i32, i32) {
    %c0_i32 = arith.constant 0 : i32
    %c0_i32_0 = arith.constant 0 : i32
    return %c0_i32, %arg2 : i32, i32
  }
  func.func @transform_2(%arg0: i32, %arg1: i32, %arg2: i32) -> (i32, i32) {
    %c0_i32 = arith.constant 0 : i32
    %c0_i32_0 = arith.constant 0 : i32
    return %c0_i32, %arg2 : i32, i32
  }
  func.func @transform_3(%arg0: i32, %arg1: i32, %arg2: i32) -> (i32, i32) {
    %0 = arith.muli %arg1, %arg2 : i32
    %c0_i32 = arith.constant 0 : i32
    return %arg0, %0 : i32, i32
  }
}

</mosaic_0001>

<bundles_post_ra>
// kernel: tpu_custom_call.1
= control target key start
LH: loop header
LB: loop body
LE: loop exit
PB: predicated region body
PF: predicated region fallthrough
CT: control target
= control target key end

     0   :  { %8 = vsyncpa [#allocation5], 0  ;;  %s852_s0 = inlined_call_operand.hbm [shape: f32[8,32], index: 0, kind: input, shape index: {}]   ;;  %s853_s1 = inlined_call_operand.hbm [shape: f32[32,128], index: 1, kind: input, shape index: {}]   ;;  %s854_s2 = inlined_call_operand.vmem [shape: f32[1,128], index: 2, kind: input, shape index: {}]   ;;  %s855_s3 = inlined_call_operand.hbm [shape: f32[8,128], index: 3, kind: output, shape index: {}]  }
   0x1   :  { %9 = vsyncpa [#allocation8], 0 }
   0x2   :  { %10 = vsyncpa [#allocation6], 0 }
   0x3   :  { %12 = vsyncpa [#allocation6 + $0x1], 0  ;;  %s753_s12 = smov 0   ;;  %s755_s13 = smov 0  }
   0x4   :  { %s757_s14 = smov 0  }
   0x5 LB: > { %s501_s15 = sadd.s32 4294967295, %s722_s14   ;;  %s502_s16 = sadd.s32 4294967294, %s722_s14   ;;  %s722_s14 = sphi %s757_s14, %s18_s14   ;;  %s718_s13 = sphi %s755_s13, %s866_s13   ;;  %s714_s12 = sphi %s753_s12, %s865_s12  }
   0x6   : > { %s33_s17 = sadd.s32 1, %s718_s13  ;;  %p503_p0 = scmp.ge.s32.totalorder %s722_s14, 1 }
   0x7   : > { %p35_p1 = scmp.ge.s32.totalorder %s33_s17, 2  ;;  %p150_p2 = scmp.lt.s32.totalorder %s722_s14, 3 }
   0x8   : > { %p775_p3 = scmp.eq.s32.totalorder %s501_s15, 0  ;;  %s724_s20 = smov [#allocation4]  }
   0x9   : > { %s868_s17 = smov (%p35_p1, %s33_s17), 0  ;;  %p781_p4 = pnand %p503_p0, %p150_p2 }
   0xa   : > { %s859_s18 = scalar_select %p775_p3, 1, 0 }
   0xb   : > { %s860_s19 = scalar_select %p781_p4, 1, 0 }
   0xc   : > { %s165_s21 = sshll.u32 %s724_s20, 4  ;;  %p548_p5 = pneg %p781_p4  ;;  %s166_s21 = int_to_ptr.vmem [resolvable:$true] %s165_s21 }
   0xd   : > { %s725_s22 = smov [#allocation7]   ;;  %s623_s25 = scalar_lea.vmem %s166_s21, 128 }
   0xe   : > { %s177_s23 = sshll.u32 %s725_s22, 4  ;;  %p789_p6 = pnand %p775_p3, %p548_p5  ;;  %s178_s23 = int_to_ptr.vmem [resolvable:$true] %s177_s23 }
   0xf   : > { %p624_p8 = scmp.ne.s32.totalorder %s166_s21, %s623_s25  ;;  %p631_p11 = scmp.lt.s32.totalorder %s166_s21, %s166_s21 }
  0x10   : > { %p614_p7 = pneg %p789_p6  ;;  %p632_p12 = scmp.lt.s32.totalorder %s623_s25, %s623_s25 }
  0x12   : > { %p626_p9 = pnand %p624_p8, %p614_p7  ;;  %p633_p13 = por %p632_p12, %p631_p11 }
  0x14   : > { %p627_p10 = pneg %p626_p9 }
  0x16   : > { %p634_p0 = pnand %p633_p13, %p627_p10 }
  0x18   : > { %637 = shalt.err (!%p634_p0)
}
  0x19   : > { %551 = dma.hbm_to_vmem [thread:$0]  (!%p789_p6), %s852_s0, 128, %s166_s21, [#allocation5]  }
  0x1a   : > { %s649_s28 = scalar_lea.vmem %s178_s23, 512  ;;  %p657_p8 = scmp.lt.s32.totalorder %s178_s23, %s178_s23 }
  0x1b   : > { %p650_p1 = scmp.ne.s32.totalorder %s178_s23, %s649_s28  ;;  %p658_p9 = scmp.lt.s32.totalorder %s649_s28, %s649_s28 }
  0x1d   : > { %p652_p2 = pnand %p650_p1, %p614_p7  ;;  %p659_p3 = por %p658_p9, %p657_p8 }
  0x1f   : > { %p653_p5 = pneg %p652_p2 }
  0x21   : > { %p660_p4 = pnand %p659_p3, %p653_p5 }
  0x23   : > { %663 = shalt.err (!%p660_p4)
}
  0x24   : > { %s726_s29 = smov 128   ;;  %s727_s30 = smov 8  }
  0x25   : > { %554 = dma.hbm_to_vmem [thread:$0]  (!%p789_p6), %s853_s1, 512, %s178_s23, [#allocation8], %s726_s29, %s726_s29, %s727_s30  }
  0x26   : > { %p862_p10 = scmp.ne.s32.totalorder %s860_s19, 0 }
  0x27   : > { %p863_p11 = scmp.ne.s32.totalorder (!%p862_p10), %s859_s18, 0 }
  0x28   : > { %199 = sbr.rel (%p862_p10) target bundleno = 770 (0x302), region = 32 }
  0x2d   : > { %701 = dma.done.wait (%p863_p11), [#allocation5], 128  }
  0x2e   : > { %703 = vsyncadd (%p863_p11), [#allocation5], 4294967168 }
  0x2f   : > { %705 = dma.done.wait (%p863_p11), [#allocation8], 512  }
  0x30   : > { %707 = vsyncadd (%p863_p11), [#allocation8], 4294966784  ;;  %p229_p3 = scmp.eq.s32.totalorder %s714_s12, 0 }
  0x31   : > { %v235_v0 = vld [vmem:[#allocation4] sm:$0xff] (%p229_p3)  ;;  %vm237_vm0 = vcmask (%p229_p3), 261120   ;;  %vm241_vm1 = vcmask (%p229_p3), 7168   ;;  %v728_v3 = vmov (%p229_p3), 0.0  }
  0x32   : > { %234 = sbr.rel (!%p229_p3) target bundleno = 192 (0xc0), region = 44  ;;  %v236_v1 = vmul.f32 (%p229_p3), %v235_v0, %v235_v0  ;;  %243 = vst.msk [vmem:[#allocation3] sm:$0xff] (%p229_p3), %vm241_vm1, %v728_v3 }
  0x34   : > { %v238_v2 = vsel (%p229_p3), %vm237_vm0, %v236_v1, 0.0 }
  0x35   : > { %239 = vadd.xlane.f32.xlu0 (%p229_p3), %v238_v2 }
  0xbe   : > { %v240_v4 = vpop.xlane.xlu0 %239 }
  0xbf   : > { %242 = vst.msk [vmem:[#allocation2] sm:$0xff] %vm241_vm1, %v240_v4 }
  0xc0 PF: > { %v248_v5 = vld [vmem:[#allocation7 + $0x18] sm:$0xff]  ;;  %v729_v6 = vmov 0.0   ;;  %v247_v7 = vld [vmem:[#allocation7 + $0x10] sm:$0xff]  ;;  %vm730_vm2 = vmmov 0   ;;  %v246_v8 = vld [vmem:[#allocation7 + $0x8] sm:$0xff]  ;;  %vm249_vm3 = vcmask 261120  }
  0xc1   : > { %525 = vmatprep.subr.mxu0 %v729_v6  ;;  %533 = vmatprep.mubr.msk.f32.mxu0 %vm730_vm2, %v729_v6  ;;  %v245_v9 = vld [vmem:[#allocation7] sm:$0xff]  ;;  %v244_v10 = vld [vmem:[#allocation4] sm:$0xff]  ;;  %p512_p4 = scmp.ne.s32.totalorder %s714_s12, 0 }
  0xc2   : > { %526 = vmatpush3.msra.mxu0 %v248_v5 }
  0xc3   : > { %527 = vmatprep.subr.mxu0 %v729_v6 }
  0xc4   : > { %528 = vmatpush3.msra.mxu0 %v247_v7 }
  0xc5   : > { %529 = vmatprep.subr.mxu0 %v729_v6 }
  0xc6   : > { %530 = vmatpush3.msra.mxu0 %v246_v8 }
  0xc7   : > { %531 = vmatprep.subr.mxu0 %v729_v6 }
  0xc8   : > { %532 = vmatpush3.msra.mxu0 %v245_v9 }
  0xc9   : > { %534 = vmatmul.mubr.msk.f32.vlgmr.msra.gmra.mxu0 %vm249_vm3, %v244_v10 }
 0x187   : > { %325 = sbr.rel (%p512_p4) target bundleno = 553 (0x229), region = 48 }
 0x189   : > { %v319_v11 = vpop.f32.mrf.mxu0 }
 0x18b   : > { %v535_v12 = vpop.f32.mrf.mxu0 }
 0x18c   : > { %v326_v13 = vmul.f32 1.442695, %v319_v11  ;;  %v328_v15 = vld [vmem:[#allocation3] sm:$0xff]  ;;  %vm332_vm4 = vcmask 7168  }
 0x18e   : > { %599 = vpow2.f32 %v326_v13 }
 0x19b   : > { %v600_v14 = vpop.eup %599 }
 0x19c   : > { %329 = vadd.xlane.f32.xlu0 %v600_v14 }
 0x225   : > { %v330_v16 = vpop.xlane.xlu0 %329 }
 0x226   : > { %v331_v17 = vadd.f32 %v330_v16, %v328_v15 }
 0x228   : > { %333 = vst.msk [vmem:[#allocation3] sm:$0xff] %vm332_vm4, %v331_v17 }
 0x229 PF: > { %p513_p6 = scmp.ne.s32.totalorder %s714_s12, 1 }
 0x22b   : > { %337 = sbr.rel (%p513_p6) target bundleno = 757 (0x2f5), region = 52 }
 0x230   : > { %v338_v18 = vld [vmem:[#allocation2] sm:$0xff]  ;;  %v731_v19 = vmov 0   ;;  %v372_v20 = vld [vmem:[#allocation3] sm:$0xff]  ;;  %v352_v21 = vmul.f32 0.96, %v319_v11 }
 0x231   : > { %601 = vset.pattern.permute.xlu0 %v731_v19  ;;  %v514_v22 = vld [vmem:[%s854_s2] ss:$0 sm:$0xff] }
 0x232   : > { %342 = vperm.xlu0 %601, %v338_v18   ;;  %v353_v23 = vmul.f32 %v352_v21, %v352_v21  ;;  %v369_v30 = vmul.f32 1.442695, %v352_v21  ;;  %v363_v33 = vmul.f32 0.9950042, %v352_v21 }
 0x236   : > { %375 = vperm.xlu0 %601, %v372_v20  }
 0x2ad   : > { %v343_v24 = vpop.permute.xlu0 %342 }
 0x2ae   : > { %v351_v25 = vmul.f32 %v514_v22, %v343_v24 }
 0x2b0   : > { %v354_v26 = vsub.f32 %v351_v25, %v353_v23 }
 0x2b1   : > { %v376_v40 = vpop.permute.xlu0 %375 }
 0x2b2   : > { %v355_v27 = vmax.f32 %v354_v26, 0.0 }
 0x2b4   : > { %602 = vrsqrt.f32 %v355_v27  ;;  %vm358_vm5 = vcmp.eq.f32.partialorder %v355_v27, inf  ;;  %v361_v31 = vand.u32 2147483648, %v355_v27  ;;  %vm360_vm6 = vcmp.eq.f32.partialorder %v355_v27, 0.0 }
 0x2b5   : > { %604 = vpow2.f32 %v369_v30 }
 0x2c1   : > { %v603_v28 = vpop.eup %602 }
 0x2c2   : > { %v357_v29 = vmul.f32 %v603_v28, %v355_v27  ;;  %v605_v38 = vpop.eup %604 }
 0x2c3   : > { %v371_v39 = vmul.f32 1.0010005, %v605_v38 }
 0x2c4   : > { %v359_v32 = vsel %vm358_vm5, %v355_v27, %v357_v29 }
 0x2c5   : > { %v362_v34 = vsel %vm360_vm6, %v361_v31, %v359_v32  ;;  %v378_v43 = vsub.f32 %v376_v40, %v371_v39 }
 0x2c6   : > { %v364_v35 = vmul.f32 0.099833414, %v362_v34 }
 0x2c8   : > { %v365_v36 = vsub.f32 %v363_v33, %v364_v35 }
 0x2ca   : > { %v366_v37 = vmul.f32 1.442695, %v365_v36 }
 0x2cc   : > { %606 = vpow2.f32 %v366_v37 }
 0x2d9   : > { %v607_v41 = vpop.eup %606 }
 0x2da   : > { %v368_v42 = vmul.f32 1.0010005, %v607_v41 }
 0x2dc   : > { %v379_v44 = vadd.f32 %v378_v43, %v368_v42 }
 0x2de   : > { %v380_v45 = vmul.f32 0.002, %v379_v44  ;;  %608 = vlog2.f32 %v379_v44 }
 0x2e0   : > { %v381_v46 = vadd.f32 %v380_v45, %v368_v42 }
 0x2e2   : > { %610 = vlog2.f32 %v381_v46 }
 0x2eb   : > { %v609_v47 = vpop.eup %608 }
 0x2ec   : > { %v385_v50 = vmul.f32 0.6931472, %v609_v47 }
 0x2ef   : > { %v611_v48 = vpop.eup %610 }
 0x2f0   : > { %v383_v49 = vmul.f32 0.6931472, %v611_v48 }
 0x2f2   : > { %v386_v51 = vsub.f32 %v383_v49, %v385_v50 }
 0x2f4   : > { %387 = vst [vmem:[#allocation9] sm:$0xff] %v386_v51 }
 0x2f5 PF: > { %p829_p7 = scmp.eq.s32.totalorder %s501_s15, 1  ;;  %s732_s9 = smov [#allocation9]  }
 0x2f6   : > { %s404_s10 = sshll.u32 %s732_s9, 4  ;;  %s405_s10 = int_to_ptr.vmem [resolvable:$true] %s404_s10 }
 0x2f7   : > { %s664_s11 = scalar_lea.vmem %s405_s10, 128  ;;  %s670_s12 = scalar_lea.vmem %s405_s10, 256 }
 0x2f8   : > { %p665_p12 = scmp.ne.s32.totalorder %s405_s10, %s664_s11  ;;  %p671_p1 = scmp.lt.s32.totalorder %s405_s10, %s405_s10 }
 0x2f9   : > { %p672_p2 = scmp.lt.s32.totalorder %s670_s12, %s664_s11 }
 0x2fa   : > { %p666_p13 = pnand %p665_p12, %p829_p7 }
 0x2fb   : > { %p673_p5 = por %p672_p2, %p671_p1 }
 0x2fc   : > { %p667_p0 = pneg %p666_p13 }
 0x2fe   : > { %p674_p8 = pnand %p673_p5, %p667_p0 }
 0x300   : > { %677 = shalt.err (!%p674_p8)
}
 0x301   : > { %545 = dma.vmem_to_hbm [thread:$0]  (%p829_p7), %s405_s10, 128, %s855_s3, [#allocation6]  }
 0x302 PF: > { %p564_p9 = scmp.ge.s32.totalorder %s722_s14, 2  ;;  %p565_p10 = scmp.eq.s32.totalorder %s502_s16, 1 }
 0x304   : > { %p556_p11 = pnand %p565_p10, %p564_p9 }
 0x306   : > { %p557_p3 = pneg %p556_p11 }
 0x308   : > { %709 = dma.done.wait (%p557_p3), [#allocation6], 128  }
 0x309   : > { %711 = vsyncadd (%p557_p3), [#allocation6], 4294967168  ;;  %s18_s14 = sadd.s32 1, %s722_s14   ;;  %s865_s12 = smov %s718_s13 }
 0x30a   : > { %p15_p4 = scmp.ge.s32.totalorder %s18_s14, 4   ;;  %s866_s13 = smov %s868_s17 }
 0x30c   :  { %17 = sbr.rel (!%p15_p4) target bundleno = 5 (0x5), region = 90 }
 0x311   :  { %422 = vsyncpa [#allocation5], 1 }
 0x312   :  { %424 = vsyncpa [#allocation5 + $0x1], 1 }
 0x313   :  { %425 = vsyncpa [#allocation8], 1 }
 0x314   :  { %426 = vsyncpa [#allocation6], 1 }
 0x315   :  { %428 = vsyncpa [#allocation6 + $0x1], 1 }

</bundles_post_ra>
